<compile_context>
chip_gen: v6e
topology: v6e:2x2x1
jax: 0.10.0
libtpu: 0.0.40
codegen_flags: <defaults>
</compile_context>

<pallas_src>
import functools

import jax
import jax.numpy as jnp
from jax.experimental import pallas as pl
from jax.experimental.pallas import tpu as pltpu


def unit_norm_init(num_freq_bins):
    # Matches df.modules.unit_norm_init: linspace from 1e-3 to 1e-4 over bins.
    return jnp.linspace(0.001, 0.0001, num_freq_bins, dtype=jnp.float32)


def _choose_tiles(t_total, max_tb, tbi):
    """Pick (tile_rows tb, chunk_rows tbi, n_chunks, mask_tail).

    tb is always a multiple of tbi and <= t_total; divisors of t_total are
    preferred so the ragged-tail (masked edge block) path only triggers when
    unavoidable.
    """
    tbi = int(min(tbi, t_total))
    if t_total <= tbi:
        return t_total, t_total, 1, False          # single tile == full T
    tbi = max(8, (tbi // 8) * 8)                   # keep chunk starts 8-aligned
    hi = max(tbi, min((max_tb // tbi) * tbi, (t_total // tbi) * tbi))
    tb = None
    for cand in range(hi, tbi - 1, -tbi):          # prefer a divisor of T
        if t_total % cand == 0:
            tb = cand
            break
    if tb is None:
        tb = hi                                    # ragged tail, masked in-kernel
    return tb, tbi, tb // tbi, (t_total % tb) != 0


def _eun_kernel(init_ref, l_ref, apow_ref, parity_ref, x_ref, o_ref, carry_ref,
                *, tbi, n_chunks, tb, t_total, eps, mask_tail):
    # Reset the EMA carry state at the first time-tile of every (b, c) row.
    @pl.when(pl.program_id(1) == 0)
    def _():
        carry_ref[...] = init_ref[...]

    two_f = x_ref.shape[-1]
    # Hoisted per-tile constants (resident inputs; no per-step iota/exp work).
    is_re = jnp.broadcast_to(parity_ref[...] != 0.0, (tbi, two_f))
    l_mat = l_ref[...]                             # (tbi, tbi) bf16 scan matrix
    apow = apow_ref[...]                           # (tbi, 1)  alpha^(t_local+1)

    if mask_tail:
        row = jax.lax.broadcasted_iota(jnp.int32, (tbi, 1), 0)
        t_base = pl.program_id(1) * tb

    carry = carry_ref[...]                         # (1, 2F) f32

    for c in range(n_chunks):                      # short static unroll
        start = c * tbi
        xc = x_ref[pl.ds(start, tbi), :].astype(jnp.float32)   # (tbi, 2F)
        xsq = xc * xc
        # Pair-sum re^2 + im^2, duplicated onto both lanes of every (re, im) pair.
        pair_a = pltpu.roll(xsq, shift=1, axis=1)              # lane l <- xsq[l-1]
        pair_b = pltpu.roll(xsq, shift=two_f - 1, axis=1)      # lane l <- xsq[l+1]
        sumsq = xsq + jnp.where(is_re, pair_b, pair_a)
        xabs = jnp.sqrt(jnp.maximum(sumsq, eps))
        if mask_tail:
            # Zero rows past T so edge-block garbage never reaches the matmul
            # (and the unused tail carry stays finite).
            xabs = jnp.where(row < (t_total - (t_base + start)), xabs, 0.0)

        # EMA over the chunk as a lower-triangular matmul (scan on the MXU):
        #   state[t] = sum_{k<=t} (1-a) a^(t-k) xabs[k] + a^(t+1) * carry_in
        states = jnp.dot(l_mat, xabs.astype(jnp.bfloat16),
                         preferred_element_type=jnp.float32)
        states = states + apow * carry
        carry = states[tbi - 1:tbi, :]

        # Normalize from the ref (x does not stay live across the matmul).
        o_ref[pl.ds(start, tbi), :] = (
            x_ref[pl.ds(start, tbi), :].astype(jnp.float32)
            * jax.lax.rsqrt(states)).astype(o_ref.dtype)

    carry_ref[...] = carry                         # thread to the next time tile


def exponential_unit_norm(x, init_state, alpha, eps=1e-14, max_tb=512, tbi=128):
    """JAX/Pallas equivalent of ExponentialUnitNorm.forward for x [B,C,T,F,2]."""
    B, C, T, F, two = x.shape
    assert two == 2
    alpha = float(alpha)
    assert 0.0 < alpha < 1.0, "alpha must be strictly in (0, 1)"
    BC = B * C
    two_f = 2 * F

    # Free, contiguous reshape: fold (B,C) and (F,2); last axis stays lane-dense.
    # (2F = 192 in DeepFilterNet leaves the 2nd lane-vreg half masked; accepted.)
    x2 = x.reshape(BC, T, two_f)

    tb, tbi, n_chunks, mask_tail = _choose_tiles(T, int(max_tb), int(tbi))
    n_t = pl.cdiv(T, tb)

    # Lower-triangular scan matrix: L[t, k] = (1-alpha) * alpha^(t-k) for k <= t,
    # in bf16 (explicit single-pass MXU; accumulation stays f32 in the kernel).
    ti = jnp.arange(tbi, dtype=jnp.int32)[:, None]
    ki = jnp.arange(tbi, dtype=jnp.int32)[None, :]
    expnt = jnp.maximum(ti - ki, 0).astype(jnp.float32)
    l_mat = jnp.where(ti >= ki,
                      (1.0 - alpha) * jnp.power(jnp.float32(alpha), expnt),
                      0.0).astype(jnp.bfloat16)

    # alpha^(t_local+1) weights for the carry-in (resident input).
    apow = jnp.power(jnp.float32(alpha),
                     jnp.arange(1, tbi + 1, dtype=jnp.float32)).reshape(tbi, 1)
    # Lane parity mask: 1.0 on (re) lanes, 0.0 on (im) lanes (resident input).
    parity = jnp.tile(jnp.array([1.0, 0.0], dtype=jnp.float32), F).reshape(1, two_f)
    # Initial state, duplicated onto the interleaved (re, im) lanes -> (1, 2F).
    init2 = jnp.repeat(init_state.astype(jnp.float32), 2).reshape(1, two_f)

    kernel = functools.partial(_eun_kernel, tbi=tbi, n_chunks=n_chunks, tb=tb,
                               t_total=T, eps=float(eps), mask_tail=mask_tail)

    out = pl.pallas_call(
        kernel,
        out_shape=jax.ShapeDtypeStruct((BC, T, two_f), x.dtype),
        grid_spec=pltpu.PrefetchScalarGridSpec(
            num_scalar_prefetch=0,
            grid=(BC, n_t),
            in_specs=[
                pl.BlockSpec((1, two_f), lambda b, t: (0, 0)),            # init state (resident)
                pl.BlockSpec((tbi, tbi), lambda b, t: (0, 0)),            # scan matrix (resident)
                pl.BlockSpec((tbi, 1), lambda b, t: (0, 0)),              # alpha powers (resident)
                pl.BlockSpec((1, two_f), lambda b, t: (0, 0)),            # lane parity (resident)
                pl.BlockSpec((None, tb, two_f), lambda b, t: (b, t, 0)),  # spectrum tile
            ],
            out_specs=pl.BlockSpec((None, tb, two_f), lambda b, t: (b, t, 0)),
            scratch_shapes=[pltpu.VMEM((1, two_f), jnp.float32)],         # EMA carry
        ),
        compiler_params=pltpu.CompilerParams(
            dimension_semantics=("parallel", "arbitrary"),
            vmem_limit_bytes=32 * 1024 * 1024,
        ),
    )(init2, l_mat, apow, parity, x2)

    return out.reshape(B, C, T, F, 2)


def _reference(x, init_state, alpha, eps=1e-14):
    """Pure-JAX mirror of the PyTorch forward (sequential EMA over time)."""
    B, C, T, F, _ = x.shape
    x_abs = jnp.sqrt(jnp.maximum(jnp.sum(x * x, axis=-1, keepdims=True), eps))  # [B,C,T,F,1]
    state0 = jnp.broadcast_to(init_state.reshape(1, 1, F, 1).astype(jnp.float32),
                              (B, C, F, 1))

    def step(state, xa_t):
        state = xa_t * (1.0 - alpha) + state * alpha
        return state, state

    xa = jnp.moveaxis(x_abs, 2, 0)                  # [T,B,C,F,1]
    _, states = jax.lax.scan(step, state0, xa)
    states = jnp.moveaxis(states, 0, 2)             # [B,C,T,F,1]
    return x / jnp.sqrt(states)


if __name__ == "__main__":
    key = jax.random.PRNGKey(0)
    B, C, T, F = 2, 2, 32, 64
    alpha = 0.9
    eps = 1e-14

    x = jax.random.normal(key, (B, C, T, F, 2), dtype=jnp.float32)
    init_state = unit_norm_init(F)

    ref = _reference(x, init_state, alpha, eps)
    scale = float(jnp.max(jnp.abs(ref)))

    # Default tiling: single time tile (tb == T), single inner chunk.
    out = jax.block_until_ready(exponential_unit_norm(x, init_state, alpha, eps=eps))
    assert out.shape == (B, C, T, F, 2)
    assert float(jnp.max(jnp.abs(out - ref))) < 5e-3 * scale

    # Multi time-tile + multi inner-chunk (exercises the carried EMA state).
    out2 = jax.block_until_ready(
        exponential_unit_norm(x, init_state, alpha, eps=eps, max_tb=16, tbi=8))
    assert float(jnp.max(jnp.abs(out2 - ref))) < 5e-3 * scale

    # tb does not divide T: exercises the masked edge-block (no-pad) path.
    out3 = jax.block_until_ready(
        exponential_unit_norm(x, init_state, alpha, eps=eps, max_tb=24, tbi=24))
    assert float(jnp.max(jnp.abs(out3 - ref))) < 5e-3 * scale

    print("KERNEL_OK")
</pallas_src>

<mosaic_0001>
module attributes {stable_mosaic.version = 11 : i64} {
  func.func @_eun_kernel(%arg0: i32, %arg1: i32, %arg2: memref<1x128xf32, #tpu.memory_space<vmem>>, %arg3: memref<32x32xbf16, #tpu.memory_space<vmem>>, %arg4: memref<32x1xf32, #tpu.memory_space<vmem>>, %arg5: memref<1x128xf32, #tpu.memory_space<vmem>>, %arg6: memref<1x32x128xf32, #tpu.memory_space<vmem>>, %arg7: memref<1x32x128xf32, #tpu.memory_space<vmem>>, %arg8: memref<1x128xf32, #tpu.memory_space<vmem>>) attributes {dimension_semantics = [#tpu.dimension_semantics<parallel>, #tpu.dimension_semantics<arbitrary>], iteration_bounds = array<i64: 4, 1>, scalar_prefetch = 0 : i64, scratch_operands = 1 : i64, tpu.core_type = #tpu.core_type<tc>, window_params = [{pipeline_mode = #tpu.pipeline_mode<synchronous>, transform_indices = @transform_0, window_bounds = array<i64: 1, 128>}, {pipeline_mode = #tpu.pipeline_mode<synchronous>, transform_indices = @transform_1, window_bounds = array<i64: 32, 32>}, {pipeline_mode = #tpu.pipeline_mode<synchronous>, transform_indices = @transform_2, window_bounds = array<i64: 32, 1>}, {pipeline_mode = #tpu.pipeline_mode<synchronous>, transform_indices = @transform_3, window_bounds = array<i64: 1, 128>}, {transform_indices = @transform_4, window_bounds = array<i64: 1, 32, 128>}, {transform_indices = @transform_5, window_bounds = array<i64: 1, 32, 128>}]} {
    %c0_i32 = arith.constant 0 : i32
    %0 = arith.cmpi eq, %arg1, %c0_i32 : i32
    %1 = arith.extui %0 : i1 to i32
    %c0_i32_0 = arith.constant 0 : i32
    %2 = arith.cmpi ne, %1, %c0_i32_0 : i32
    scf.if %2 {
      %c0_21 = arith.constant 0 : index
      %c0_22 = arith.constant 0 : index
      %36 = vector.load %arg2[%c0_21, %c0_22] : memref<1x128xf32, #tpu.memory_space<vmem>>, vector<1x128xf32>
      %c0_23 = arith.constant 0 : index
      %c0_24 = arith.constant 0 : index
      %37 = vector.load %arg8[%c0_23, %c0_24] : memref<1x128xf32, #tpu.memory_space<vmem>>, vector<1x128xf32>
      tpu.vector_store %arg8[%c0_23, %c0_24], %36 {strides = array<i32>} : memref<1x128xf32, #tpu.memory_space<vmem>>, vector<1x128xf32>,
    } else {
    }
    %c0 = arith.constant 0 : index
    %c0_1 = arith.constant 0 : index
    %3 = vector.load %arg5[%c0, %c0_1] : memref<1x128xf32, #tpu.memory_space<vmem>>, vector<1x128xf32>
    %cst = arith.constant 0.000000e+00 : f32
    %4 = vector.broadcast %cst : f32 to vector<1x128xf32>
    %5 = arith.cmpf one, %3, %4 : vector<1x128xf32>
    %6 = vector.shape_cast %5 : vector<1x128xi1> to vector<1x128xi1>
    %7 = vector.broadcast %6 : vector<1x128xi1> to vector<32x128xi1>
    %c0_2 = arith.constant 0 : index
    %c0_3 = arith.constant 0 : index
    %8 = vector.load %arg3[%c0_2, %c0_3] : memref<32x32xbf16, #tpu.memory_space<vmem>>, vector<32x32xbf16>
    %c0_4 = arith.constant 0 : index
    %c0_5 = arith.constant 0 : index
    %9 = vector.load %arg4[%c0_4, %c0_5] : memref<32x1xf32, #tpu.memory_space<vmem>>, vector<32x1xf32>
    %c0_6 = arith.constant 0 : index
    %c0_7 = arith.constant 0 : index
    %10 = vector.load %arg8[%c0_6, %c0_7] : memref<1x128xf32, #tpu.memory_space<vmem>>, vector<1x128xf32>
    %c0_8 = arith.constant 0 : index
    %c0_9 = arith.constant 0 : index
    %c0_10 = arith.constant 0 : index
    %11 = vector.load %arg6[%c0_8, %c0_9, %c0_10] : memref<1x32x128xf32, #tpu.memory_space<vmem>>, vector<1x32x128xf32>
    %12 = vector.shape_cast %11 : vector<1x32x128xf32> to vector<32x128xf32>
    %13 = arith.mulf %12, %12 : vector<32x128xf32>
    %c1_i32 = arith.constant 1 : i32
    %14 = tpu.dynamic_rotate %13 by %c1_i32 dim 1 : vector<32x128xf32>, i32 -> vector<32x128xf32>
    %c127_i32 = arith.constant 127 : i32
    %15 = tpu.dynamic_rotate %13 by %c127_i32 dim 1 : vector<32x128xf32>, i32 -> vector<32x128xf32>
    %16 = arith.select %7, %15, %14 : vector<32x128xi1>, vector<32x128xf32>
    %17 = arith.addf %13, %16 : vector<32x128xf32>
    %cst_11 = arith.constant 9.99999982E-15 : f32
    %18 = vector.broadcast %cst_11 : f32 to vector<32x128xf32>
    %19 = arith.maximumf %17, %18 : vector<32x128xf32>
    %20 = math.sqrt %19 : vector<32x128xf32>
    %21 = arith.truncf %20 : vector<32x128xf32> to vector<32x128xbf16>
    %cst_12 = arith.constant dense<0.000000e+00> : vector<32x128xf32>
    %22 = tpu.matmul %8, %21, %cst_12 {dimension_numbers = #tpu.dot_dimension_numbers<[1], [0], [0], [1], [0, 0, 1, 1], [], []>} : vector<32x32xbf16>, vector<32x128xbf16>, vector<32x128xf32> -> vector<32x128xf32>
    %23 = vector.broadcast %9 : vector<32x1xf32> to vector<32x128xf32>
    %24 = vector.broadcast %10 : vector<1x128xf32> to vector<32x128xf32>
    %25 = arith.mulf %23, %24 : vector<32x128xf32>
    %26 = arith.addf %22, %25 : vector<32x128xf32>
    %27 = vector.extract_strided_slice %26 {offsets = [31, 0], sizes = [1, 128], strides = [1, 1]} : vector<32x128xf32> to vector<1x128xf32>
    %c0_13 = arith.constant 0 : index
    %c0_14 = arith.constant 0 : index
    %c0_15 = arith.constant 0 : index
    %28 = vector.load %arg6[%c0_13, %c0_14, %c0_15] : memref<1x32x128xf32, #tpu.memory_space<vmem>>, vector<1x32x128xf32>
    %29 = vector.shape_cast %28 : vector<1x32x128xf32> to vector<32x128xf32>
    %30 = math.rsqrt %26 : vector<32x128xf32>
    %31 = arith.mulf %29, %30 : vector<32x128xf32>
    %c0_16 = arith.constant 0 : index
    %c0_17 = arith.constant 0 : index
    %c0_18 = arith.constant 0 : index
    %32 = vector.load %arg7[%c0_16, %c0_17, %c0_18] : memref<1x32x128xf32, #tpu.memory_space<vmem>>, vector<1x32x128xf32>
    %33 = vector.shape_cast %32 : vector<1x32x128xf32> to vector<32x128xf32>
    %34 = vector.shape_cast %31 : vector<32x128xf32> to vector<1x32x128xf32>
    tpu.vector_store %arg7[%c0_16, %c0_17, %c0_18], %34 {strides = array<i32>} : memref<1x32x128xf32, #tpu.memory_space<vmem>>, vector<1x32x128xf32>,
    %c0_19 = arith.constant 0 : index
    %c0_20 = arith.constant 0 : index
    %35 = vector.load %arg8[%c0_19, %c0_20] : memref<1x128xf32, #tpu.memory_space<vmem>>, vector<1x128xf32>
    tpu.vector_store %arg8[%c0_19, %c0_20], %27 {strides = array<i32>} : memref<1x128xf32, #tpu.memory_space<vmem>>, vector<1x128xf32>,
    return
  }
  func.func @transform_0(%arg0: i32, %arg1: i32) -> (i32, i32) {
    %c0_i32 = arith.constant 0 : i32
    %c0_i32_0 = arith.constant 0 : i32
    %c0_i32_1 = arith.constant 0 : i32
    return %c0_i32, %c0_i32_0 : i32, i32
  }
  func.func @transform_1(%arg0: i32, %arg1: i32) -> (i32, i32) {
    %c0_i32 = arith.constant 0 : i32
    %c0_i32_0 = arith.constant 0 : i32
    %c0_i32_1 = arith.constant 0 : i32
    return %c0_i32, %c0_i32_0 : i32, i32
  }
  func.func @transform_2(%arg0: i32, %arg1: i32) -> (i32, i32) {
    %c0_i32 = arith.constant 0 : i32
    %c0_i32_0 = arith.constant 0 : i32
    %c0_i32_1 = arith.constant 0 : i32
    return %c0_i32, %c0_i32_0 : i32, i32
  }
  func.func @transform_3(%arg0: i32, %arg1: i32) -> (i32, i32) {
    %c0_i32 = arith.constant 0 : i32
    %c0_i32_0 = arith.constant 0 : i32
    %c0_i32_1 = arith.constant 0 : i32
    return %c0_i32, %c0_i32_0 : i32, i32
  }
  func.func @transform_4(%arg0: i32, %arg1: i32) -> (i32, i32, i32) {
    %c0_i32 = arith.constant 0 : i32
    %c0_i32_0 = arith.constant 0 : i32
    return %arg0, %arg1, %c0_i32 : i32, i32, i32
  }
  func.func @transform_5(%arg0: i32, %arg1: i32) -> (i32, i32, i32) {
    %c0_i32 = arith.constant 0 : i32
    %c0_i32_0 = arith.constant 0 : i32
    return %arg0, %arg1, %c0_i32 : i32, i32, i32
  }
}

</mosaic_0001>

<bundles_post_ra>
// kernel: tpu_custom_call.1
= control target key start
LH: loop header
LB: loop body
LE: loop exit
PB: predicated region body
PF: predicated region fallthrough
CT: control target
= control target key end

     0   :  { %10 = vsyncpa [#allocation4], 0  ;;  %s1035_s0 = inlined_call_operand.vmem [shape: f32[1,128], index: 0, kind: input, shape index: {}]   ;;  %s1036_s1 = inlined_call_operand.vmem [shape: bf16[32,32], index: 1, kind: input, shape index: {}]   ;;  %s1037_s2 = inlined_call_operand.vmem [shape: f32[32,1], index: 2, kind: input, shape index: {}]   ;;  %s1038_s3 = inlined_call_operand.vmem [shape: f32[1,128], index: 3, kind: input, shape index: {}]   ;;  %s1039_s4 = inlined_call_operand.hbm [shape: f32[4,32,128], index: 4, kind: input, shape index: {}]   ;;  %s1040_s5 = inlined_call_operand.hbm [shape: f32[4,32,128], index: 5, kind: output, shape index: {}]  }
   0x1   :  { %12 = vsyncpa [#allocation4 + $0x1], 0 }
   0x2   :  { %13 = vsyncpa [#allocation5], 0 }
   0x3   :  { %15 = vsyncpa [#allocation5 + $0x1], 0  ;;  %s837_s18 = smov 0   ;;  %s839_s19 = smov 0  }
   0x4   :  { %s841_s20 = smov 0   ;;  %s843_s21 = smov 0  }
   0x5   :  { %s845_s22 = smov 0   ;;  %s847_s23 = smov 0  }
   0x6 LB: > { %s565_s24 = sadd.s32 4294967295, %s796_s23   ;;  %s566_s25 = sadd.s32 4294967294, %s796_s23   ;;  %s796_s23 = sphi %s847_s23, %s21_s23   ;;  %s792_s22 = sphi %s845_s22, %s1050_s22   ;;  %s788_s21 = sphi %s843_s21, %s1049_s21   ;;  %s784_s20 = sphi %s841_s20, %s1048_s20   ;;  %s780_s19 = sphi %s839_s19, %s1047_s19   ;;  %s776_s18 = sphi %s837_s18, %s1046_s18  }
   0x7   : > { %s33_s26 = sadd.s32 1, %s792_s22  ;;  %s126_s27 = sadd.s32 1, %s784_s20 }
   0x8   : > { %p35_p0 = scmp.ge.s32.totalorder %s33_s26, 4  ;;  %p133_p1 = scmp.ne.s32.totalorder %s784_s20, %s780_s19 }
   0x9   : > { %p134_p2 = scmp.eq.s32.totalorder %s796_s23, 0  ;;  %p139_p3 = scmp.ne.s32.totalorder %s780_s19, %s776_s18 }
   0xa   : > { %s1052_s26 = smov (%p35_p0, %s33_s26), 0  ;;  %p140_p5 = scmp.eq.s32.totalorder %s565_s24, 0 }
   0xb   : > { %p878_p4 = por %p134_p2, %p133_p1  ;;  %s121_s29 = ssub.s32 %s792_s22, %s1052_s26 }
   0xc   : > { %p165_p6 = scmp.eq.s32.totalorder %s565_s24, 3  ;;  %p124_p7 = scmp.eq.s32.totalorder %s121_s29, 0 }
   0xd   : > { %p884_p8 = por %p140_p5, %p139_p3  ;;  %p171_p10 = scmp.eq.s32.totalorder %s566_s25, 3 }
   0xe   : > { %p888_p9 = por %p165_p6, %p133_p1  ;;  %p611_p12 = scmp.lt.s32.totalorder %s796_s23, 4 }
   0xf   : > { %s893_s7 = scalar_select %p124_p7, %s784_s20, %s126_s27  }
  0x10   : > { %p895_p11 = por %p171_p10, %p139_p3  ;;  %s203_s9 = sand.u32 1, %s784_s20  }
  0x11   : > { %s569_s10 = sshll.u32 %s203_s9, 5  ;;  %s585_s11 = sshll.u32 %s792_s22, 9 }
  0x12   : > { %s215_s14 = scalar_lea.hbm %s1039_s4, %s585_s11  ;;  %s207_s15 = scalar_lea.vmem [#allocation3], %s569_s10 }
  0x13   : > { %s216_s16 = sshll.u32 %s207_s15, 4  ;;  %p907_p13 = pnand %p611_p12, %p878_p4  ;;  %s217_s16 = int_to_ptr.vmem [resolvable:$true] %s216_s16 }
  0x14   : > { %p572_p0 = scmp.ge.s32.totalorder %s796_s23, 1  ;;  %s204_s24 = scalar_lea.sflag [#allocation4], %s203_s9 }
  0x15   : > { %p690_p1 = pneg %p907_p13  ;;  %s701_s25 = scalar_lea.vmem %s217_s16, 512 }
  0x16   : > { %p702_p2 = scmp.ne.s32.totalorder %s217_s16, %s701_s25  ;;  %s798_s27 = smov [#allocation3]  }
  0x17   : > { %s706_s29 = sshll.u32 %s798_s27, 4  ;;  %s707_s29 = int_to_ptr.vmem [resolvable:$false] %s706_s29 }
  0x18   : > { %p704_p3 = pnand %p702_p2, %p690_p1  ;;  %s708_s10 = scalar_lea.vmem %s707_s29, 1024 }
  0x19   : > { %p709_p6 = scmp.lt.s32.totalorder %s217_s16, %s707_s29  ;;  %p710_p7 = scmp.lt.s32.totalorder %s708_s10, %s701_s25 }
  0x1a   : > { %p705_p5 = pneg %p704_p3 }
  0x1b   : > { %p711_p10 = por %p710_p7, %p709_p6 }
  0x1d   : > { %p712_p4 = pnand %p711_p10, %p705_p5 }
  0x1f   : > { %715 = shalt.err (!%p712_p4)
}
  0x20   : > { %s799_s28 = smov 128   ;;  %s800_s9 = smov 8  }
  0x21   : > { %606 = dma.hbm_to_vmem [thread:$0]  (!%p907_p13), %s215_s14, 512, %s217_s16, %s204_s24, %s799_s28, %s799_s28, %s800_s9  }
  0x22   : > { %p224_p12 = scmp.lt.s32.totalorder %s796_s23, 5 }
  0x24   : > { %p225_p1 = pnand %p572_p0, %p224_p12 }
  0x25   : > { %s920_s11 = sand.u32 (!%p225_p1), 1, %s780_s19  }
  0x26   : > { %228 = sbr.rel (%p225_p1) target bundleno = 435 (0x1b3), region = 40  ;;  %s573_s12 = sshll.u32 (!%p225_p1), %s920_s11, 5 }
  0x27   : > { %s231_s13 = scalar_lea.sflag (!%p225_p1), [#allocation4], %s920_s11  ;;  %s234_s15 = scalar_lea.vmem (!%p225_p1), [#allocation3], %s573_s12 }
  0x2b   : > { %767 = dma.done.wait (%p884_p8), %s231_s13, 512  }
  0x2c   : > { %769 = vsyncadd (%p884_p8), %s231_s13, 4294966784  ;;  %v801_v0 = vmov 0   ;;  %v930_v1 = vld [vmem:[%s234_s15 + $0x10] sm:$0xff]  ;;  %v932_v2 = vld [vmem:[%s234_s15 + $0x18] sm:$0xff]  ;;  %s802_s14 = smov 127   ;;  %s803_s16 = smov 1   ;;  %v273_v15 = vlaneseq }
  0x2d   : > { %669 = vset.pattern.permute.xlu1 %v801_v0  ;;  %668 = vset.pattern.permute.xlu0 %v801_v0  ;;  %v293_v3 = vmul.f32 %v930_v1, %v930_v1  ;;  %v294_v4 = vmul.f32 %v932_v2, %v932_v2  ;;  %v938_v5 = vld [vmem:[%s234_s15 + $0x8] sm:$0xff]  ;;  %v940_v6 = vld [vmem:[%s234_s15] sm:$0xff]  ;;  %vm393_vm0 = vcmask 261120   ;;  %v268_v12 = vld [vmem:[%s1035_s0] sm:$0x1]  ;;  %s260_s25 = scalar_lea.vmem [#allocation6], %s573_s12 }
  0x2e   : > { %v292_v7 = vmul.f32 %v938_v5, %v938_v5  ;;  %v291_v8 = vmul.f32 %v940_v6, %v940_v6  ;;  %v670_v9 = vld [vmem:[%s1036_s1] sm:$0xff]   ;;  %v283_v10 = vld [vmem:[%s1037_s2 + $0x8] sm:$0xff]  ;;  %v284_v13 = vld [vmem:[%s1037_s2 + $0x10] sm:$0xff]  ;;  %269 = vst [vmem:[#allocation2] sm:$0x1] %v268_v12  ;;  %v274_v17 = vshrl.u32 %v273_v15, 7 }
  0x2f   : > { %307 = vrot.lane.b32.xlu1 %v293_v3, %s802_s14  ;;  %299 = vrot.lane.b32.xlu0 %v293_v3, %s803_s16  ;;  %v282_v11 = vld [vmem:[%s1037_s2] sm:$0xff]  ;;  %v285_v14 = vld [vmem:[%s1037_s2 + $0x18] sm:$0xff]  ;;  %s586_s27 = sshll.u32 %s788_s21, 9  ;;  %s478_s29 = sshll.u32 %s260_s25, 4  ;;  %s987_s29 = int_to_ptr.vmem [resolvable:$true] %s478_s29 }
  0x30   : > { %595 = vmatprep.mubr.msk.bf16.mxu0 %vm393_vm0, %v670_v9  ;;  %v270_v16 = vld [vmem:[%s1038_s3] sm:$0x1]  ;;  %v275_v18 = vsub.s32 0, %v274_v17  ;;  %v671_v63 = vld [vmem:[%s1036_s1 + $0x8] sm:$0xff]   ;;  %s985_s9 = scalar_lea.hbm %s1040_s5, %s586_s27  ;;  %s463_s21 = scalar_lea.sflag [#allocation5], %s920_s11 }
  0x31   : > { %vm271_vm1 = vcmp.ne.f32.partialorder %v270_v16, 0.0  ;;  %s716_s12 = scalar_lea.vmem %s987_s29, 512  ;;  %s804_s13 = smov [#allocation6]  }
  0x32   : > { %v272_v19 = vsel %vm271_vm1, 1, %v801_v0  ;;  %p717_p8 = scmp.ne.s32.totalorder %s987_s29, %s716_s12  ;;  %s720_s15 = sshll.u32 %s804_s13, 4  ;;  %s721_s15 = int_to_ptr.vmem [resolvable:$false] %s720_s15 }
  0x33   : > { %309 = vrot.lane.b32.xlu1 %v294_v4, %s802_s14  ;;  %301 = vrot.lane.b32.xlu0 %v294_v4, %s803_s16  ;;  %v276_v20 = vrot.slane %v272_v19, %v275_v18  ;;  %p723_p2 = scmp.lt.s32.totalorder %s987_s29, %s721_s15 }
  0x34   : > { %p718_p13 = pnand %p717_p8, %p888_p9 }
  0x35   : > { %vm277_vm2 = vcmp.eq.s32.totalorder %v276_v20, 1 }
  0x36   : > { %p719_p0 = pneg %p718_p13 }
  0x37   : > { %297 = vrot.lane.b32.xlu1 %v292_v7, %s803_s16  ;;  %295 = vrot.lane.b32.xlu0 %v291_v8, %s803_s16 }
  0x3b   : > { %305 = vrot.lane.b32.xlu1 %v292_v7, %s802_s14  ;;  %303 = vrot.lane.b32.xlu0 %v291_v8, %s802_s14  ;;  %s722_s14 = scalar_lea.vmem %s721_s15, 1024 }
  0x3c   : > { %p724_p3 = scmp.lt.s32.totalorder %s722_s14, %s716_s12 }
  0x3e   : > { %p725_p5 = por %p724_p3, %p723_p2 }
  0x3f   : > { %360 = vperm.xlu1 %669, %v283_v10   ;;  %355 = vperm.xlu0 %668, %v282_v11  }
  0x40   : > { %p726_p6 = pnand %p725_p5, %p719_p0 }
  0x43   : > { %365 = vperm.xlu1 %669, %v284_v13   ;;  %370 = vperm.xlu0 %668, %v285_v14  }
  0xa1   : > { %v308_v21 = vpop.permute.xlu1 %307  ;;  %v300_v22 = vpop.permute.xlu0 %299 }
  0xa2   : > { %v313_v23 = vsel %vm277_vm2, %v308_v21, %v300_v22 }
  0xa3   : > { %v317_v24 = vadd.f32 %v313_v23, %v293_v3  ;;  %v575_v3 = vld [vmem:[#allocation2] ss:$0 sm:$0xff] }
  0xa5   : > { %v321_v25 = vmax.f32 %v317_v24, 1e-14  ;;  %v310_v26 = vpop.permute.xlu1 %309  ;;  %v302_v27 = vpop.permute.xlu0 %301 }
  0xa6   : > { %v314_v28 = vsel %vm277_vm2, %v310_v26, %v302_v27 }
  0xa7   : > { %672 = vrsqrt.f32 %v321_v25  ;;  %v318_v29 = vadd.f32 %v314_v28, %v294_v4  ;;  %vm339_vm3 = vcmp.eq.f32.partialorder %v321_v25, inf  ;;  %v342_v46 = vand.u32 2147483648, %v321_v25 }
  0xa8   : > { %vm341_vm5 = vcmp.eq.f32.partialorder %v321_v25, 0.0 }
  0xa9   : > { %v322_v30 = vmax.f32 %v318_v29, 1e-14  ;;  %v298_v31 = vpop.permute.xlu1 %297  ;;  %v296_v32 = vpop.permute.xlu0 %295 }
  0xab   : > { %674 = vrsqrt.f32 %v322_v30  ;;  %vm346_vm4 = vcmp.eq.f32.partialorder %v322_v30, inf  ;;  %v349_v47 = vand.u32 2147483648, %v322_v30  ;;  %vm348_vm6 = vcmp.eq.f32.partialorder %v322_v30, 0.0 }
  0xad   : > { %v306_v33 = vpop.permute.xlu1 %305  ;;  %v304_v34 = vpop.permute.xlu0 %303 }
  0xae   : > { %v312_v35 = vsel %vm277_vm2, %v306_v33, %v298_v31  ;;  %v311_v36 = vsel %vm277_vm2, %v304_v34, %v296_v32 }
  0xaf   : > { %v316_v37 = vadd.f32 %v312_v35, %v292_v7  ;;  %v315_v38 = vadd.f32 %v311_v36, %v291_v8 }
  0xb1   : > { %v320_v39 = vmax.f32 %v316_v37, 1e-14  ;;  %v319_v40 = vmax.f32 %v315_v38, 1e-14 }
  0xb3   : > { %676 = vrsqrt.f32 %v320_v39  ;;  %vm332_vm7 = vcmp.eq.f32.partialorder %v320_v39, inf  ;;  %v335_v56 = vand.u32 2147483648, %v320_v39  ;;  %vm325_vm8 = vcmp.eq.f32.partialorder %v319_v40, inf }
  0xb4   : > { %v673_v41 = vpop.eup %672  ;;  %678 = vrsqrt.f32 %v319_v40  ;;  %v328_v57 = vand.u32 2147483648, %v319_v40  ;;  %vm334_vm9 = vcmp.eq.f32.partialorder %v320_v39, 0.0  ;;  %vm327_vm10 = vcmp.eq.f32.partialorder %v319_v40, 0.0 }
  0xb5   : > { %v338_v42 = vmul.f32 %v673_v41, %v321_v25 }
  0xb7   : > { %v340_v44 = vsel %vm339_vm3, %v321_v25, %v338_v42 }
  0xb8   : > { %v675_v43 = vpop.eup %674  ;;  %v343_v49 = vsel %vm341_vm5, %v342_v46, %v340_v44 }
  0xb9   : > { %v345_v45 = vmul.f32 %v675_v43, %v322_v30 }
  0xba   : > { %v361_v0 = vpop.permute.xlu1 %360  ;;  %v356_v4 = vpop.permute.xlu0 %355 }
  0xbb   : > { %v347_v48 = vsel %vm346_vm4, %v322_v30, %v345_v45  ;;  %v379_v9 = vmul.f32 %v575_v3, %v356_v4  ;;  %v380_v17 = vmul.f32 %v575_v3, %v361_v0 }
  0xbc   : > { %v350_v50 = vsel %vm348_vm6, %v349_v47, %v347_v48 }
  0xbd   : > { %v352_v51 = vpack.c.bf16 %v350_v50, %v343_v49 }
  0xbe   : > { %v366_v7 = vpop.permute.xlu1 %365  ;;  %v371_v10 = vpop.permute.xlu0 %370 }
  0xbf   : > { %591 = vmatprep.subr.bf16.mxu0 %v352_v51  ;;  %v381_v8 = vmul.f32 %v575_v3, %v366_v7  ;;  %v382_v14 = vmul.f32 %v575_v3, %v371_v10 }
  0xc0   : > { %v677_v52 = vpop.eup %676  ;;  %592 = vmatpush3.bf16.msra.mxu0 %v352_v51 }
  0xc1   : > { %v679_v53 = vpop.eup %678  ;;  %v331_v54 = vmul.f32 %v677_v52, %v320_v39 }
  0xc2   : > { %v324_v55 = vmul.f32 %v679_v53, %v319_v40 }
  0xc3   : > { %v333_v58 = vsel %vm332_vm7, %v320_v39, %v331_v54 }
  0xc4   : > { %v326_v59 = vsel %vm325_vm8, %v319_v40, %v324_v55  ;;  %v336_v60 = vsel %vm334_vm9, %v335_v56, %v333_v58 }
  0xc5   : > { %v329_v61 = vsel %vm327_vm10, %v328_v57, %v326_v59 }
  0xc6   : > { %v351_v62 = vpack.c.bf16 %v336_v60, %v329_v61 }
  0xc8   : > { %593 = vmatprep.subr.bf16.mxu0 %v351_v62 }
  0xc9   : > { %594 = vmatpush3.bf16.msra.mxu0 %v351_v62 }
  0xcc   : > { %596 = vmatmul.mubr.msk.bf16.vlgmr.msra.gmra.mxu0 %vm393_vm0, %v671_v63 }
 0x18c   : > { %v597_v11 = vpop.f32.mrf.mxu0 }
 0x18d   : > { %v443_v12 = vadd.f32 %v597_v11, %v381_v8 }
 0x18e   : > { %v434_v13 = vpop.f32.mrf.mxu0 }
 0x18f   : > { %680 = vrsqrt.f32 %v443_v12  ;;  %v435_v15 = vadd.f32 %v434_v13, %v379_v9 }
 0x190   : > { %v598_v16 = vpop.f32.mrf.mxu0 }
 0x191   : > { %682 = vrsqrt.f32 %v435_v15  ;;  %v446_v18 = vadd.f32 %v598_v16, %v382_v14 }
 0x192   : > { %v437_v19 = vpop.f32.mrf.mxu0 }
 0x193   : > { %684 = vrsqrt.f32 %v446_v18  ;;  %461 = vst [vmem:[#allocation2 - $0x7] sm:$0x80] %v446_v18  ;;  %v438_v20 = vadd.f32 %v437_v19, %v380_v17 }
 0x195   : > { %686 = vrsqrt.f32 %v438_v20 }
 0x19c   : > { %v681_v21 = vpop.eup %680 }
 0x19d   : > { %v455_v22 = vmul.f32 %v681_v21, %v930_v1 }
 0x19e   : > { %v683_v23 = vpop.eup %682 }
 0x19f   : > { %459 = vst [vmem:[%s260_s25 + $0x10] sm:$0xff] %v455_v22  ;;  %v453_v24 = vmul.f32 %v683_v23, %v940_v6 }
 0x1a0   : > { %v685_v25 = vpop.eup %684 }
 0x1a1   : > { %457 = vst [vmem:[%s260_s25] sm:$0xff] %v453_v24  ;;  %v456_v26 = vmul.f32 %v685_v25, %v932_v2 }
 0x1a2   : > { %v687_v27 = vpop.eup %686 }
 0x1a3   : > { %460 = vst [vmem:[%s260_s25 + $0x18] sm:$0xff] %v456_v26  ;;  %v454_v1 = vmul.f32 %v687_v27, %v938_v5 }
 0x1a5   : > { %458 = vst [vmem:[%s260_s25 + $0x8] sm:$0xff] %v454_v1 }
 0x1a6   : > { %729 = shalt.err (!%p726_p6)
}
 0x1a7   : > { %s730_s16 = scalar_lea.hbm %s985_s9, 512  ;;  %s734_s24 = scalar_lea.hbm %s1040_s5, 2048 }
 0x1a8   : > { %p731_p7 = scmp.ne.s32.totalorder %s985_s9, %s730_s16  ;;  %p735_p12 = scmp.lt.s32.totalorder %s985_s9, %s1040_s5 }
 0x1a9   : > { %p736_p1 = scmp.lt.s32.totalorder %s734_s24, %s730_s16 }
 0x1aa   : > { %p732_p10 = pnand %p731_p7, %p888_p9 }
 0x1ab   : > { %p737_p8 = por %p736_p1, %p735_p12 }
 0x1ac   : > { %p733_p4 = pneg %p732_p10 }
 0x1ae   : > { %p738_p13 = pnand %p737_p8, %p733_p4 }
 0x1b0   : > { %741 = shalt.err (!%p738_p13)
}
 0x1b1   : > { %s805_s10 = smov 128   ;;  %s806_s28 = smov 8  }
 0x1b2   : > { %601 = dma.vmem_to_hbm [thread:$0]  (%p888_p9), %s987_s29, 512, %s985_s9, %s463_s21, %s805_s10, %s805_s10, %s806_s28  }
 0x1b3 PF: > { %p612_p0 = scmp.ge.s32.totalorder %s796_s23, 2  ;;  %s493_s12 = sand.u32 1, %s776_s18  }
 0x1b4   : > { %s494_s13 = scalar_lea.sflag [#allocation5], %s493_s12 }
 0x1b5   : > { %p608_p2 = pnand %p612_p0, %p895_p11 }
 0x1b7   : > { %p609_p3 = pneg %p608_p2 }
 0x1b9   : > { %771 = dma.done.wait (%p609_p3), %s494_s13, 512  }
 0x1ba   : > { %773 = vsyncadd (%p609_p3), %s494_s13, 4294966784  ;;  %s21_s23 = sadd.s32 1, %s796_s23   ;;  %s1046_s18 = smov %s780_s19 }
 0x1bb   : > { %p18_p5 = scmp.ge.s32.totalorder %s21_s23, 6   ;;  %s1047_s19 = smov %s784_s20 }
 0x1bc   : > { %s1048_s20 = smov %s893_s7  ;;  %s1049_s21 = smov %s792_s22 }
 0x1bd   : > { %s1050_s22 = smov %s1052_s26  ;;  %20 = sbr.rel (!%p18_p5) target bundleno = 6 (0x6), region = 89 }
 0x1c2   :  { %499 = vsyncpa [#allocation4], 1 }
 0x1c3   :  { %501 = vsyncpa [#allocation4 + $0x1], 1 }
 0x1c4   :  { %502 = vsyncpa [#allocation5], 1 }
 0x1c5   :  { %504 = vsyncpa [#allocation5 + $0x1], 1 }

</bundles_post_ra>
